<compile_context>
chip_gen: v7x
topology: tpu7x:2x2x1
jax: 0.10.0
libtpu: 0.0.40
codegen_flags: <defaults>
</compile_context>

<pallas_src>
import functools

import numpy as np

import jax
import jax.numpy as jnp
from jax.experimental import pallas as pl
from jax.experimental.pallas import tpu as pltpu


_H_IN = 28          # spatial size required by adv_layer (hidden_dim * 4 * 4 features)
_N_ROWS = 144       # 9 conv3 taps x 16 conv3 output positions


# ---------------------------------------------------------------------------
# Static (shape-only) plan, built once with numpy at trace time.
# ---------------------------------------------------------------------------
@functools.lru_cache(maxsize=None)
def _static_plan(cin):
    """Folds the spatial structure of conv1/conv2/conv3 (+ paddings) into a
    single index table on the zero-padded 30x30 input image.

      row = t3*16 + r3        (conv3 tap, conv3 output position)  -> 144 rows
      col = t2*(9*cin) + (ci, k1i, k1j)  (conv2 tap, conv1 patch)  -> 9*9*cin cols

    Entries that must be exactly zero (conv zero padding, ZeroPad2d region,
    rows outside the padded 8x8 grid) point at padded pixel 0 (always 0)."""
    kp = 9 * cin
    hp = _H_IN + 2                       # 30 (padded input)
    h1 = (_H_IN + 2 - 3) // 2 + 1        # 14 (conv1 output grid)
    idx = np.zeros((_N_ROWS, 9 * kp), np.int32)
    tap_ok = np.zeros((_N_ROWS, 9), np.float32)       # conv2 tap hits a real conv1 output
    row_is_conv2 = np.zeros((_N_ROWS,), np.float32)   # row is a real (non-pad) conv2 output
    row_in_grid = np.zeros((_N_ROWS,), np.float32)    # row is inside the padded 8x8 grid
    for t3 in range(9):
        k3i, k3j = divmod(t3, 3)
        for r3 in range(16):
            oh3, ow3 = divmod(r3, 4)
            row = t3 * 16 + r3
            ph = 2 * oh3 + k3i - 1       # position in the 8x8 ZeroPad2d'd grid
            pw = 2 * ow3 + k3j - 1
            if not (0 <= ph < 8 and 0 <= pw < 8):
                continue                 # conv3 zero padding -> tap value must be 0
            row_in_grid[row] = 1.0
            if ph >= 7 or pw >= 7:
                continue                 # ZeroPad2d((0,1,0,1)) region -> conv2 out = 0
            row_is_conv2[row] = 1.0
            for t2 in range(9):
                k2i, k2j = divmod(t2, 3)
                qh = 2 * ph + k2i - 1    # conv1 output position feeding this tap
                qw = 2 * pw + k2j - 1
                if not (0 <= qh < h1 and 0 <= qw < h1):
                    continue             # conv2 zero padding -> whole 27-col block stays 0
                tap_ok[row, t2] = 1.0
                for ci in range(cin):
                    for k1i in range(3):
                        for k1j in range(3):
                            col = t2 * kp + ci * 9 + k1i * 3 + k1j
                            idx[row, col] = (ci * hp + 2 * qh + k1i) * hp + (2 * qw + k1j)
    return idx, tap_ok, row_is_conv2, row_in_grid


# ---------------------------------------------------------------------------
# The single fused kernel: one batch sample per grid step, all in VMEM.
# ---------------------------------------------------------------------------
def _discriminator_kernel(cols_ref, w1_ref, b1_ref, w2_ref, s2_ref, sh2_ref,
                          keep_ref, w3_ref, s3_ref, sh3_ref, wl_ref, bl_ref,
                          out_ref):
    f32, bf16 = jnp.float32, jnp.bfloat16

    def leaky(v):
        return jnp.where(v >= 0, v, 0.2 * v)

    # conv1 (+ bias + LeakyReLU).  The host expanded the im2col to the
    # (conv3-tap, conv3-pos, conv2-tap) grid and w1 is block-diagonal over the
    # 9 conv2 taps, so the result IS conv2's im2col: (144, 9*C1), K folded.
    z1 = jnp.dot(cols_ref[...], w1_ref[...], preferred_element_type=f32)
    cols2 = leaky(z1 + b1_ref[...])

    # conv2 -> ZeroPad2d -> BatchNorm2 -> LeakyReLU.  conv2 bias folded into
    # the per-row shift (zero on ZeroPad rows); rows outside the 8x8 grid are
    # zeroed so they act as conv3's zero padding.  Epilogue stays in f32.
    z2 = jnp.dot(cols2.astype(bf16), w2_ref[...], preferred_element_type=f32)
    a2 = keep_ref[...] * leaky(z2 * s2_ref[...] + sh2_ref[...])       # (144, C2)

    # conv3 -> BatchNorm3 (+ folded conv bias) -> LeakyReLU.  a2's rows are
    # 9 tap-major, tile-aligned blocks of the 16 output positions: one clean
    # reshape + a single batched contraction over the taps (no per-tap loop).
    n_tap, c2 = w3_ref.shape[0], w3_ref.shape[1]
    a2r = a2.reshape(n_tap, 16, c2).astype(bf16)                       # (9, 16, C2)
    z3 = jnp.einsum("trc,tco->tro", a2r, w3_ref[...],
                    preferred_element_type=f32)
    z3 = jnp.sum(z3, axis=0)                                           # (16, C3)
    a3 = leaky(z3 * s3_ref[...] + sh3_ref[...])

    # adv layer: NCHW flatten + Linear + Sigmoid done on the VPU (no MXU).
    prod = a3 * wl_ref[...]                                            # (16, C3)
    logit = jnp.sum(jnp.sum(prod, axis=1, keepdims=True), axis=0, keepdims=True)
    out_ref[...] = jax.nn.sigmoid(logit + bl_ref[...])


# ---------------------------------------------------------------------------
# Wrapper: fold params into kernel operands and launch one pallas_call.
# ---------------------------------------------------------------------------
def discriminator_forward(params, img):
    eps = 0.8                                # nn.BatchNorm2d(C, 0.8) -> eps = 0.8
    B, cin, H, W = img.shape
    assert (H, W) == (_H_IN, _H_IN), "adv_layer requires 28x28 inputs"
    w1, b1 = params["w1"], params["b1"]
    w2, b2 = params["w2"], params["b2"]
    w3, b3 = params["w3"], params["b3"]
    C1, C2, C3 = w1.shape[0], w2.shape[0], w3.shape[0]
    kp = 9 * cin
    f32, bf16 = jnp.float32, jnp.bfloat16

    idx, tap_ok, row_is_conv2, row_in_grid = _static_plan(cin)

    # Per-sample input: one gather of the padded image into the expanded conv1
    # im2col (144 x 9*kp).  O(B) bytes; pipelined one sample per grid step.
    xp = jnp.pad(img, ((0, 0), (0, 0), (1, 1), (1, 1))).reshape(B, -1)
    cols1 = jnp.take(xp, jnp.asarray(idx.reshape(-1)), axis=1)
    cols1 = cols1.reshape(B, _N_ROWS, 9 * kp).astype(bf16)

    # Batch-independent constants (same block every grid step -> fetched once).
    w1_flat = w1.reshape(C1, kp).T                                        # (kp, C1)
    w1_big = jnp.kron(jnp.eye(9, dtype=w1.dtype), w1_flat).astype(bf16)   # (9kp, 9C1)
    b1_exp = (jnp.asarray(tap_ok)[:, :, None] * b1[None, None, :]
              ).reshape(_N_ROWS, 9 * C1).astype(f32)

    w2r = jnp.transpose(w2, (2, 3, 1, 0)).reshape(9 * C1, C2).astype(bf16)
    s2v = params["g2"] / jnp.sqrt(1.0 + eps)
    s2 = s2v.reshape(1, C2).astype(f32)
    sh2 = (params["be2"][None, :]
           + jnp.asarray(row_is_conv2)[:, None] * (s2v * b2)[None, :]).astype(f32)
    keep3 = jnp.asarray(row_in_grid).reshape(_N_ROWS, 1).astype(f32)

    w3r = jnp.transpose(w3, (2, 3, 1, 0)).reshape(9, C2, C3).astype(bf16)
    s3v = params["g3"] / jnp.sqrt(1.0 + eps)
    s3 = s3v.reshape(1, C3).astype(f32)
    sh3 = (s3v * b3 + params["be3"]).reshape(1, C3).astype(f32)

    wl_hwc = params["wl"].reshape(C3, 16).T.astype(f32)                   # (16, C3)
    blv = params["bl"].reshape(1, 1).astype(f32)

    consts = (w1_big, b1_exp, w2r, s2, sh2, keep3, w3r, s3, sh3, wl_hwc, blv)

    def const_spec(a):
        return pl.BlockSpec(a.shape, lambda b, _n=a.ndim: (0,) * _n)

    in_specs = ([pl.BlockSpec((None, _N_ROWS, 9 * kp), lambda b: (b, 0, 0))]
                + [const_spec(a) for a in consts])

    flops = 2 * B * (_N_ROWS * (9 * kp) * (9 * C1)
                     + _N_ROWS * (9 * C1) * C2
                     + 9 * 16 * C2 * C3
                     + 16 * C3)
    bytes_accessed = int(cols1.size * 2
                         + sum(a.size * a.dtype.itemsize for a in consts)
                         + B * 4)

    out = pl.pallas_call(
        _discriminator_kernel,
        out_shape=jax.ShapeDtypeStruct((B, 1, 1), f32),
        grid=(B,),
        in_specs=in_specs,
        out_specs=pl.BlockSpec((None, 1, 1), lambda b: (b, 0, 0)),
        compiler_params=pltpu.CompilerParams(
            dimension_semantics=("parallel",),
        ),
        cost_estimate=pl.CostEstimate(
            flops=flops, transcendentals=B, bytes_accessed=bytes_accessed),
    )(cols1, *consts)
    return out.reshape(B, 1)


# ---------------------------------------------------------------------------
# Pure-JAX reference (eval-mode PyTorch semantics) for correctness checking.
# ---------------------------------------------------------------------------
def _reference_forward(params, img):
    eps = 0.8

    def conv(x, w, b):
        y = jax.lax.conv_general_dilated(
            x, w, window_strides=(2, 2), padding=((1, 1), (1, 1)),
            dimension_numbers=("NCHW", "OIHW", "NCHW"))
        return y + b.reshape(1, -1, 1, 1)

    def leaky(v):
        return jnp.where(v >= 0, v, 0.2 * v)

    h = leaky(conv(img, params["w1"], params["b1"]))
    h = conv(h, params["w2"], params["b2"])
    h = jnp.pad(h, ((0, 0), (0, 0), (0, 1), (0, 1)))
    h = leaky(params["g2"].reshape(1, -1, 1, 1) / jnp.sqrt(1.0 + eps) * h
              + params["be2"].reshape(1, -1, 1, 1))
    h = conv(h, params["w3"], params["b3"])
    h = leaky(params["g3"].reshape(1, -1, 1, 1) / jnp.sqrt(1.0 + eps) * h
              + params["be3"].reshape(1, -1, 1, 1))
    flat = h.reshape(h.shape[0], -1)
    return jax.nn.sigmoid(flat @ params["wl"].T + params["bl"])


# ---------------------------------------------------------------------------
# Parameters (deterministic, synthetic) and demo.
# ---------------------------------------------------------------------------
def init_params(key, img_channels, hidden_dim):
    c1, c2, c3 = hidden_dim // 4, hidden_dim // 2, hidden_dim
    ks = jax.random.split(key, 12)
    n = jax.random.normal
    return {
        "w1": 0.1 * n(ks[0], (c1, img_channels, 3, 3), jnp.float32),
        "b1": 0.1 * n(ks[1], (c1,), jnp.float32),
        "w2": 0.1 * n(ks[2], (c2, c1, 3, 3), jnp.float32),
        "b2": 0.1 * n(ks[3], (c2,), jnp.float32),
        "g2": 1.0 + 0.1 * n(ks[4], (c2,), jnp.float32),
        "be2": 0.1 * n(ks[5], (c2,), jnp.float32),
        "w3": 0.1 * n(ks[6], (c3, c2, 3, 3), jnp.float32),
        "b3": 0.1 * n(ks[7], (c3,), jnp.float32),
        "g3": 1.0 + 0.1 * n(ks[8], (c3,), jnp.float32),
        "be3": 0.1 * n(ks[9], (c3,), jnp.float32),
        "wl": 0.1 * n(ks[10], (1, c3 * 4 * 4), jnp.float32),   # Linear weight (1, in)
        "bl": 0.1 * n(ks[11], (1,), jnp.float32),
    }


if __name__ == "__main__":
    key = jax.random.PRNGKey(0)
    k_param, k_img = jax.random.split(key)

    img_channels, hidden_dim = 3, 32
    # adv_layer expects hidden_dim*4*4 features -> input spatial must be 28x28
    # (28 -> 14 -> 7 -> pad 8 -> 4).
    img = jax.random.normal(k_img, (2, img_channels, 28, 28), jnp.float32)
    params = init_params(k_param, img_channels, hidden_dim)

    fwd = jax.jit(discriminator_forward)
    out = fwd(params, img)
    jax.block_until_ready(out)

    assert out.shape == (2, 1)
    assert bool(jnp.all((out >= 0.0) & (out <= 1.0)))

    ref = _reference_forward(params, img)
    assert bool(jnp.allclose(out, ref, atol=2e-2)), (out, ref)

    print("KERNEL_OK")
</pallas_src>

<mosaic_0001>
module attributes {stable_mosaic.version = 11 : i64} {
  func.func @_discriminator_kernel(%arg0: i32, %arg1: memref<1x144x243xbf16, #tpu.memory_space<vmem>>, %arg2: memref<243x72xbf16, #tpu.memory_space<vmem>>, %arg3: memref<144x72xf32, #tpu.memory_space<vmem>>, %arg4: memref<72x16xbf16, #tpu.memory_space<vmem>>, %arg5: memref<1x16xf32, #tpu.memory_space<vmem>>, %arg6: memref<144x16xf32, #tpu.memory_space<vmem>>, %arg7: memref<144x1xf32, #tpu.memory_space<vmem>>, %arg8: memref<9x16x32xbf16, #tpu.memory_space<vmem>>, %arg9: memref<1x32xf32, #tpu.memory_space<vmem>>, %arg10: memref<1x32xf32, #tpu.memory_space<vmem>>, %arg11: memref<16x32xf32, #tpu.memory_space<vmem>>, %arg12: memref<1x1xf32, #tpu.memory_space<vmem>>, %arg13: memref<1x1x1xf32, #tpu.memory_space<vmem>>) attributes {dimension_semantics = [#tpu.dimension_semantics<parallel>], iteration_bounds = array<i64: 2>, scalar_prefetch = 0 : i64, scratch_operands = 0 : i64, tpu.core_type = #tpu.core_type<tc>, window_params = [{transform_indices = @transform_0, window_bounds = array<i64: 1, 144, 243>}, {pipeline_mode = #tpu.pipeline_mode<synchronous>, transform_indices = @transform_1, window_bounds = array<i64: 243, 72>}, {pipeline_mode = #tpu.pipeline_mode<synchronous>, transform_indices = @transform_2, window_bounds = array<i64: 144, 72>}, {pipeline_mode = #tpu.pipeline_mode<synchronous>, transform_indices = @transform_3, window_bounds = array<i64: 72, 16>}, {pipeline_mode = #tpu.pipeline_mode<synchronous>, transform_indices = @transform_4, window_bounds = array<i64: 1, 16>}, {pipeline_mode = #tpu.pipeline_mode<synchronous>, transform_indices = @transform_5, window_bounds = array<i64: 144, 16>}, {pipeline_mode = #tpu.pipeline_mode<synchronous>, transform_indices = @transform_6, window_bounds = array<i64: 144, 1>}, {pipeline_mode = #tpu.pipeline_mode<synchronous>, transform_indices = @transform_7, window_bounds = array<i64: 9, 16, 32>}, {pipeline_mode = #tpu.pipeline_mode<synchronous>, transform_indices = @transform_8, window_bounds = array<i64: 1, 32>}, {pipeline_mode = #tpu.pipeline_mode<synchronous>, transform_indices = @transform_9, window_bounds = array<i64: 1, 32>}, {pipeline_mode = #tpu.pipeline_mode<synchronous>, transform_indices = @transform_10, window_bounds = array<i64: 16, 32>}, {pipeline_mode = #tpu.pipeline_mode<synchronous>, transform_indices = @transform_11, window_bounds = array<i64: 1, 1>}, {transform_indices = @transform_12, window_bounds = array<i64: 1, 1, 1>}]} {
    %c0 = arith.constant 0 : index
    %c0_0 = arith.constant 0 : index
    %c0_1 = arith.constant 0 : index
    %0 = vector.load %arg1[%c0, %c0_0, %c0_1] : memref<1x144x243xbf16, #tpu.memory_space<vmem>>, vector<1x144x243xbf16>
    %1 = vector.shape_cast %0 : vector<1x144x243xbf16> to vector<144x243xbf16>
    %c0_2 = arith.constant 0 : index
    %c0_3 = arith.constant 0 : index
    %2 = vector.load %arg2[%c0_2, %c0_3] : memref<243x72xbf16, #tpu.memory_space<vmem>>, vector<243x72xbf16>
    %cst = arith.constant dense<0.000000e+00> : vector<144x72xf32>
    %3 = tpu.matmul %1, %2, %cst {dimension_numbers = #tpu.dot_dimension_numbers<[1], [0], [0], [1], [0, 0, 1, 1], [], []>} : vector<144x243xbf16>, vector<243x72xbf16>, vector<144x72xf32> -> vector<144x72xf32>
    %c0_4 = arith.constant 0 : index
    %c0_5 = arith.constant 0 : index
    %4 = vector.load %arg3[%c0_4, %c0_5] : memref<144x72xf32, #tpu.memory_space<vmem>>, vector<144x72xf32>
    %5 = arith.addf %3, %4 : vector<144x72xf32>
    %cst_6 = arith.constant 0.000000e+00 : f32
    %6 = vector.broadcast %cst_6 : f32 to vector<144x72xf32>
    %7 = arith.cmpf oge, %5, %6 : vector<144x72xf32>
    %cst_7 = arith.constant 2.000000e-01 : f32
    %8 = vector.broadcast %cst_7 : f32 to vector<144x72xf32>
    %9 = arith.mulf %8, %5 : vector<144x72xf32>
    %10 = arith.select %7, %5, %9 : vector<144x72xi1>, vector<144x72xf32>
    %11 = arith.truncf %10 : vector<144x72xf32> to vector<144x72xbf16>
    %c0_8 = arith.constant 0 : index
    %c0_9 = arith.constant 0 : index
    %12 = vector.load %arg4[%c0_8, %c0_9] : memref<72x16xbf16, #tpu.memory_space<vmem>>, vector<72x16xbf16>
    %cst_10 = arith.constant dense<0.000000e+00> : vector<144x16xf32>
    %13 = tpu.matmul %11, %12, %cst_10 {dimension_numbers = #tpu.dot_dimension_numbers<[1], [0], [0], [1], [0, 0, 1, 1], [], []>} : vector<144x72xbf16>, vector<72x16xbf16>, vector<144x16xf32> -> vector<144x16xf32>
    %c0_11 = arith.constant 0 : index
    %c0_12 = arith.constant 0 : index
    %14 = vector.load %arg7[%c0_11, %c0_12] : memref<144x1xf32, #tpu.memory_space<vmem>>, vector<144x1xf32>
    %c0_13 = arith.constant 0 : index
    %c0_14 = arith.constant 0 : index
    %15 = vector.load %arg5[%c0_13, %c0_14] : memref<1x16xf32, #tpu.memory_space<vmem>>, vector<1x16xf32>
    %16 = vector.broadcast %15 : vector<1x16xf32> to vector<144x16xf32>
    %17 = arith.mulf %13, %16 : vector<144x16xf32>
    %c0_15 = arith.constant 0 : index
    %c0_16 = arith.constant 0 : index
    %18 = vector.load %arg6[%c0_15, %c0_16] : memref<144x16xf32, #tpu.memory_space<vmem>>, vector<144x16xf32>
    %19 = arith.addf %17, %18 : vector<144x16xf32>
    %cst_17 = arith.constant 0.000000e+00 : f32
    %20 = vector.broadcast %cst_17 : f32 to vector<144x16xf32>
    %21 = arith.cmpf oge, %19, %20 : vector<144x16xf32>
    %cst_18 = arith.constant 2.000000e-01 : f32
    %22 = vector.broadcast %cst_18 : f32 to vector<144x16xf32>
    %23 = arith.mulf %22, %19 : vector<144x16xf32>
    %24 = arith.select %21, %19, %23 : vector<144x16xi1>, vector<144x16xf32>
    %25 = vector.broadcast %14 : vector<144x1xf32> to vector<144x16xf32>
    %26 = arith.mulf %25, %24 : vector<144x16xf32>
    %27 = vector.shape_cast %26 : vector<144x16xf32> to vector<9x16x16xf32>
    %28 = arith.truncf %27 : vector<9x16x16xf32> to vector<9x16x16xbf16>
    %c0_19 = arith.constant 0 : index
    %c0_20 = arith.constant 0 : index
    %c0_21 = arith.constant 0 : index
    %29 = vector.load %arg8[%c0_19, %c0_20, %c0_21] : memref<9x16x32xbf16, #tpu.memory_space<vmem>>, vector<9x16x32xbf16>
    "tpu.trace_start"() <{level = 10 : i32, message = "trc,tco->tro"}> : () -> ()
    %cst_22 = arith.constant dense<0.000000e+00> : vector<9x16x32xf32>
    %30 = tpu.matmul %28, %29, %cst_22 {dimension_numbers = #tpu.dot_dimension_numbers<[2], [1], [1], [2], [0, 0, 0, 1, 1, 2], [0], [0]>} : vector<9x16x16xbf16>, vector<9x16x32xbf16>, vector<9x16x32xf32> -> vector<9x16x32xf32>
    "tpu.trace_stop"() : () -> ()
    %cst_23 = arith.constant dense<0.000000e+00> : vector<16x32xf32>
    %31 = vector.multi_reduction <add>, %30, %cst_23 [0] : vector<9x16x32xf32> to vector<16x32xf32>
    %c0_24 = arith.constant 0 : index
    %c0_25 = arith.constant 0 : index
    %32 = vector.load %arg9[%c0_24, %c0_25] : memref<1x32xf32, #tpu.memory_space<vmem>>, vector<1x32xf32>
    %33 = vector.broadcast %32 : vector<1x32xf32> to vector<16x32xf32>
    %34 = arith.mulf %31, %33 : vector<16x32xf32>
    %c0_26 = arith.constant 0 : index
    %c0_27 = arith.constant 0 : index
    %35 = vector.load %arg10[%c0_26, %c0_27] : memref<1x32xf32, #tpu.memory_space<vmem>>, vector<1x32xf32>
    %36 = vector.broadcast %35 : vector<1x32xf32> to vector<16x32xf32>
    %37 = arith.addf %34, %36 : vector<16x32xf32>
    %cst_28 = arith.constant 0.000000e+00 : f32
    %38 = vector.broadcast %cst_28 : f32 to vector<16x32xf32>
    %39 = arith.cmpf oge, %37, %38 : vector<16x32xf32>
    %cst_29 = arith.constant 2.000000e-01 : f32
    %40 = vector.broadcast %cst_29 : f32 to vector<16x32xf32>
    %41 = arith.mulf %40, %37 : vector<16x32xf32>
    %42 = arith.select %39, %37, %41 : vector<16x32xi1>, vector<16x32xf32>
    %c0_30 = arith.constant 0 : index
    %c0_31 = arith.constant 0 : index
    %43 = vector.load %arg11[%c0_30, %c0_31] : memref<16x32xf32, #tpu.memory_space<vmem>>, vector<16x32xf32>
    %44 = arith.mulf %42, %43 : vector<16x32xf32>
    %cst_32 = arith.constant dense<0.000000e+00> : vector<16xf32>
    %45 = vector.multi_reduction <add>, %44, %cst_32 [1] : vector<16x32xf32> to vector<16xf32>
    %46 = vector.shape_cast %45 : vector<16xf32> to vector<16x1xf32>
    %cst_33 = arith.constant dense<0.000000e+00> : vector<1xf32>
    %47 = vector.multi_reduction <add>, %46, %cst_33 [0] : vector<16x1xf32> to vector<1xf32>
    %48 = vector.shape_cast %47 : vector<1xf32> to vector<1x1xf32>
    %c0_34 = arith.constant 0 : index
    %c0_35 = arith.constant 0 : index
    %49 = vector.load %arg12[%c0_34, %c0_35] : memref<1x1xf32, #tpu.memory_space<vmem>>, vector<1x1xf32>
    %50 = arith.addf %48, %49 : vector<1x1xf32>
    %51 = arith.negf %50 : vector<1x1xf32>
    %52 = math.exp %51 : vector<1x1xf32>
    %cst_36 = arith.constant 1.000000e+00 : f32
    %53 = vector.broadcast %cst_36 : f32 to vector<1x1xf32>
    %54 = arith.addf %53, %52 : vector<1x1xf32>
    %55 = arith.divf %53, %54 : vector<1x1xf32>
    %c0_37 = arith.constant 0 : index
    %c0_38 = arith.constant 0 : index
    %c0_39 = arith.constant 0 : index
    %56 = vector.load %arg13[%c0_37, %c0_38, %c0_39] : memref<1x1x1xf32, #tpu.memory_space<vmem>>, vector<1x1x1xf32>
    %57 = vector.shape_cast %56 : vector<1x1x1xf32> to vector<1x1xf32>
    %58 = vector.shape_cast %55 : vector<1x1xf32> to vector<1x1x1xf32>
    tpu.vector_store %arg13[%c0_37, %c0_38, %c0_39], %58 {strides = array<i32>} : memref<1x1x1xf32, #tpu.memory_space<vmem>>, vector<1x1x1xf32>,
    return
  }
  func.func @transform_0(%arg0: i32) -> (i32, i32, i32) {
    %c0_i32 = arith.constant 0 : i32
    %c0_i32_0 = arith.constant 0 : i32
    %c0_i32_1 = arith.constant 0 : i32
    return %arg0, %c0_i32, %c0_i32_0 : i32, i32, i32
  }
  func.func @transform_1(%arg0: i32) -> (i32, i32) {
    %c0_i32 = arith.constant 0 : i32
    %c0_i32_0 = arith.constant 0 : i32
    %c0_i32_1 = arith.constant 0 : i32
    return %c0_i32, %c0_i32_0 : i32, i32
  }
  func.func @transform_2(%arg0: i32) -> (i32, i32) {
    %c0_i32 = arith.constant 0 : i32
    %c0_i32_0 = arith.constant 0 : i32
    %c0_i32_1 = arith.constant 0 : i32
    return %c0_i32, %c0_i32_0 : i32, i32
  }
  func.func @transform_3(%arg0: i32) -> (i32, i32) {
    %c0_i32 = arith.constant 0 : i32
    %c0_i32_0 = arith.constant 0 : i32
    %c0_i32_1 = arith.constant 0 : i32
    return %c0_i32, %c0_i32_0 : i32, i32
  }
  func.func @transform_4(%arg0: i32) -> (i32, i32) {
    %c0_i32 = arith.constant 0 : i32
    %c0_i32_0 = arith.constant 0 : i32
    %c0_i32_1 = arith.constant 0 : i32
    return %c0_i32, %c0_i32_0 : i32, i32
  }
  func.func @transform_5(%arg0: i32) -> (i32, i32) {
    %c0_i32 = arith.constant 0 : i32
    %c0_i32_0 = arith.constant 0 : i32
    %c0_i32_1 = arith.constant 0 : i32
    return %c0_i32, %c0_i32_0 : i32, i32
  }
  func.func @transform_6(%arg0: i32) -> (i32, i32) {
    %c0_i32 = arith.constant 0 : i32
    %c0_i32_0 = arith.constant 0 : i32
    %c0_i32_1 = arith.constant 0 : i32
    return %c0_i32, %c0_i32_0 : i32, i32
  }
  func.func @transform_7(%arg0: i32) -> (i32, i32, i32) {
    %c0_i32 = arith.constant 0 : i32
    %c0_i32_0 = arith.constant 0 : i32
    %c0_i32_1 = arith.constant 0 : i32
    %c0_i32_2 = arith.constant 0 : i32
    return %c0_i32, %c0_i32_0, %c0_i32_1 : i32, i32, i32
  }
  func.func @transform_8(%arg0: i32) -> (i32, i32) {
    %c0_i32 = arith.constant 0 : i32
    %c0_i32_0 = arith.constant 0 : i32
    %c0_i32_1 = arith.constant 0 : i32
    return %c0_i32, %c0_i32_0 : i32, i32
  }
  func.func @transform_9(%arg0: i32) -> (i32, i32) {
    %c0_i32 = arith.constant 0 : i32
    %c0_i32_0 = arith.constant 0 : i32
    %c0_i32_1 = arith.constant 0 : i32
    return %c0_i32, %c0_i32_0 : i32, i32
  }
  func.func @transform_10(%arg0: i32) -> (i32, i32) {
    %c0_i32 = arith.constant 0 : i32
    %c0_i32_0 = arith.constant 0 : i32
    %c0_i32_1 = arith.constant 0 : i32
    return %c0_i32, %c0_i32_0 : i32, i32
  }
  func.func @transform_11(%arg0: i32) -> (i32, i32) {
    %c0_i32 = arith.constant 0 : i32
    %c0_i32_0 = arith.constant 0 : i32
    %c0_i32_1 = arith.constant 0 : i32
    return %c0_i32, %c0_i32_0 : i32, i32
  }
  func.func @transform_12(%arg0: i32) -> (i32, i32, i32) {
    %c0_i32 = arith.constant 0 : i32
    %c0_i32_0 = arith.constant 0 : i32
    %c0_i32_1 = arith.constant 0 : i32
    return %arg0, %c0_i32, %c0_i32_0 : i32, i32, i32
  }
}

</mosaic_0001>

<bundles_post_ra>
// kernel: discriminator_forward.1
= control target key start
LH: loop header
LB: loop body
LE: loop exit
PB: predicated region body
PF: predicated region fallthrough
CT: control target
= control target key end

     0   :  { %s2327_s23 = smov 0   ;;  %s2752_s0 = inlined_call_operand.vmem [shape: bf16[2,144,243], index: 0, kind: input, shape index: {}]   ;;  %s2753_s1 = inlined_call_operand.vmem [shape: bf16[243,72], index: 1, kind: input, shape index: {}]   ;;  %s2754_s2 = inlined_call_operand.vmem [shape: f32[144,72], index: 2, kind: input, shape index: {}]   ;;  %s2755_s3 = inlined_call_operand.vmem [shape: bf16[72,16], index: 3, kind: input, shape index: {}]   ;;  %s2756_s4 = inlined_call_operand.vmem [shape: f32[1,16], index: 4, kind: input, shape index: {}]   ;;  %s2757_s5 = inlined_call_operand.vmem [shape: f32[144,16], index: 5, kind: input, shape index: {}]   ;;  %s2758_s6 = inlined_call_operand.vmem [shape: f32[144,1], index: 6, kind: input, shape index: {}]   ;;  %s2759_s7 = inlined_call_operand.vmem [shape: bf16[9,16,32], index: 7, kind: input, shape index: {}]   ;;  %s2760_s8 = inlined_call_operand.vmem [shape: f32[1,32], index: 8, kind: input, shape index: {}]   ;;  %s2761_s9 = inlined_call_operand.vmem [shape: f32[1,32], index: 9, kind: input, shape index: {}]   ;;  %s2762_s10 = inlined_call_operand.vmem [shape: f32[16,32], index: 10, kind: input, shape index: {}]   ;;  %s2763_s11 = inlined_call_operand.<no memory space> [shape: f32[1,1], index: 11, kind: input, shape index: {}]   ;;  %s2764_s12 = inlined_call_operand.vmem [shape: f32[2,1,1], index: 12, kind: output, shape index: {}]  }
   0x1   :  { %v17_v0 = vstv %s2763_s11 }
   0x2   :  { %18 = vst [vmem:[#allocation2] sm:$0x1] %v17_v0 }
   0x3 LB: > { %s1882_s24 = sadd.s32 4294967295, %s2253_s23   ;;  %p1886_p0 = scmp.ge.s32.totalorder %s2253_s23, 1  ;;  %s2253_s23 = sphi %s2327_s23, %s24_s23  }
   0x4   : > { %p364_p1 = scmp.lt.s32.totalorder %s2253_s23, 3 }
   0x6   : > { %p365_p2 = pnand %p1886_p0, %p364_p1 }
   0x7   : > { %v2186_v1 = vld [vmem:[%s2753_s1 + $0x40] sm:$0xff] (!%p365_p2)   ;;  %v2188_v3 = vld [vmem:[%s2753_s1 + $0x48] sm:$0xff] (!%p365_p2)   ;;  %v2190_v5 = vld [vmem:[%s2753_s1 + $0x50] sm:$0xff] (!%p365_p2)   ;;  %p404_p3 = scmp.lt.s32.totalorder (!%p365_p2), %s1882_s24, 1  ;;  %v2255_v8 = vmov (!%p365_p2), 0.0   ;;  %vm682_vm0 = vcmask (!%p365_p2), 1040384  }
   0x8   : > { %368 = sbr.rel (%p365_p2) target bundleno = 965 (0x3c5), region = 68  ;;  %v2187_v2 = vld [vmem:[%s2753_s1] sm:$0xff] (!%p365_p2)   ;;  %1969 = vmatprep.subr.bf16.mxu0 (!%p365_p2), %v2186_v1  ;;  %v2189_v4 = vld [vmem:[%s2753_s1 + $0x8] sm:$0xff] (!%p365_p2)   ;;  %v2191_v6 = vld [vmem:[%s2753_s1 + $0x10] sm:$0xff] (!%p365_p2)   ;;  %2071 = vmatprep.subr.bf16.mxu1 (!%p365_p2), %v2255_v8  ;;  %vm654_vm1 = vcmask (!%p365_p2), 941056   ;;  %vm683_vm2 = vcmask (!%p365_p2), 1041408  }
   0x9   : > { %1970 = vmatpush3.bf16.msra.mxu0 (!%p365_p2), %v2187_v2  ;;  %v2192_v7 = vld [vmem:[%s2753_s1 + $0x58] sm:$0xff] (!%p365_p2)   ;;  %v2194_v10 = vld [vmem:[%s2753_s1 + $0x60] sm:$0xff] (!%p365_p2)   ;;  %v2196_v12 = vld [vmem:[%s2753_s1 + $0x68] sm:$0xff] (!%p365_p2)   ;;  %v2256_v14 = vmov (!%p365_p2), 65535   ;;  %vm921_vm3 = vcmask (!%p365_p2), 1043456   ;;  %vm2257_vm4 = vmmov (!%p365_p2), 0  }
   0xa   : > { %1971 = vmatprep.subr.bf16.mxu0 (!%p365_p2), %v2188_v3  ;;  %v2193_v9 = vld [vmem:[%s2753_s1 + $0x18] sm:$0xff] (!%p365_p2)   ;;  %v2195_v11 = vld [vmem:[%s2753_s1 + $0x20] sm:$0xff] (!%p365_p2)   ;;  %v684_v15 = vsel (!%p365_p2), %vm682_vm0, 4294967295, %v2256_v14  ;;  %v2197_v16 = vld [vmem:[%s2753_s1 + $0x28] sm:$0xff] (!%p365_p2)   ;;  %2081 = vmatprep.mubr.msk.bf16.mxu1 (!%p365_p2), %vm2257_vm4, %v2255_v8  ;;  %v2258_v48 = vmov (!%p365_p2), 0   ;;  %vm893_vm7 = vcmask (!%p365_p2), 588800  }
   0xb   : > { %v2198_v17 = vld [vmem:[%s2753_s1 + $0x70] sm:$0xff] (!%p365_p2)   ;;  %v2200_v18 = vld [vmem:[%s2753_s1 + $0x78] ss:$0 sps:$4 sm:$0x33] (!%p365_p2)   ;;  %v685_v19 = vsel (!%p365_p2), %vm683_vm2, %v684_v15, 0  ;;  %v2229_v24 = vld [vmem:[%s2755_s3] sm:$0xff] (!%p365_p2)   ;;  %2184 = vset.pattern.permute.xlu0 (!%p365_p2), %v2258_v48  ;;  %2185 = vset.pattern.permute.xlu1 (!%p365_p2), %v2258_v48 }
   0xc   : > { %v2199_v20 = vld [vmem:[%s2753_s1 + $0x30] sm:$0xff] (!%p365_p2)   ;;  %v687_v21 = vand.u32 (!%p365_p2), %v2200_v18, %v685_v19  ;;  %v2201_v22 = vld [vmem:[%s2753_s1 + $0x38] sm:$0xff] (!%p365_p2)   ;;  %v2230_v26 = vld [vmem:[%s2755_s3 + $0x8] sm:$0xff] (!%p365_p2)   ;;  %2072 = vmatpush3.bf16.msra.mxu1 (!%p365_p2), %v2229_v24 }
   0xd   : > { %1972 = vmatpush3.bf16.msra.mxu0 (!%p365_p2), %v2189_v4  ;;  %2073 = vmatprep.subr.bf16.mxu1 (!%p365_p2), %v2255_v8  ;;  %v2231_v42 = vld [vmem:[%s2755_s3 + $0x10] sm:$0xff] (!%p365_p2)   ;;  %v2232_v43 = vld [vmem:[%s2755_s3 + $0x18] sm:$0xff] (!%p365_p2)   ;;  %v2233_v44 = vld [vmem:[%s2755_s3 + $0x20] ss:$0 sps:$4 sm:$0xff] (!%p365_p2)  }
   0xe   : > { %1973 = vmatprep.subr.bf16.mxu0 (!%p365_p2), %v2190_v5  ;;  %v923_v45 = vsel (!%p365_p2), %vm921_vm3, %v2233_v44, 0  ;;  %v1030_v46 = vld [vmem:[%s2758_s6] sm:$0xff] (!%p365_p2)  ;;  %v1032_v47 = vld [vmem:[%s2758_s6 + $0x10] sm:$0xff] (!%p365_p2)  ;;  %v1031_v49 = vld [vmem:[%s2758_s6 + $0x8] sm:$0xff] (!%p365_p2) }
   0xf   : > { %s2766_s24 = smov (!%p404_p3, %s1882_s24), 1  ;;  %1165 = vperm.xlu0 %2184, %v1030_v46   ;;  %1175 = vperm.xlu1 %2185, %v1032_v47   ;;  %v1033_v50 = vld [vmem:[%s2758_s6 + $0x18] sm:$0xff]  ;;  %v2235_v51 = vld [vmem:[%s2759_s7 + $0x10] sm:$0xff]   ;;  %v1034_v52 = vld [vmem:[%s2758_s6 + $0x20] sm:$0xff] }
  0x10   : > { %s2171_s20 = smul.u32 144, %s2766_s24  ;;  %2074 = vmatpush3.bf16.msra.mxu1 %v2230_v26  ;;  %v1035_v53 = vld [vmem:[%s2758_s6 + $0x28] sm:$0xff]  ;;  %v1036_v54 = vld [vmem:[%s2758_s6 + $0x30] sm:$0xff]  ;;  %v1037_v55 = vld [vmem:[%s2758_s6 + $0x38] sm:$0xff] }
  0x11   : > { %1974 = vmatpush3.bf16.msra.mxu0 %v2191_v6  ;;  %2075 = vmatprep.subr.bf16.mxu1 %v2255_v8  ;;  %v1038_v56 = vld [vmem:[%s2758_s6 + $0x40] sm:$0xff]  ;;  %v1039_v57 = vld [vmem:[%s2758_s6 + $0x48] sm:$0xff]  ;;  %v1040_v58 = vld [vmem:[%s2758_s6 + $0x50] sm:$0xff] }
  0x12   : > { %1975 = vmatprep.subr.bf16.mxu0 %v2192_v7  ;;  %s2369_s28 = scalar_lea.vmem %s2752_s0, %s2171_s20  ;;  %v1041_v59 = vld [vmem:[%s2758_s6 + $0x58] sm:$0xff]  ;;  %v1042_v60 = vld [vmem:[%s2758_s6 + $0x60] sm:$0xff]  ;;  %v1043_v61 = vld [vmem:[%s2758_s6 + $0x68] sm:$0xff]  ;;  %s411_s20 = scalar_lea.vmem %s2764_s12, %s2766_s24 }
  0x13   : > { %v2204_v13 = vld [vmem:[%s2369_s28 + $0x4] ss:$8 sps:$4 sm:$0xff]   ;;  %v2202_v23 = vld [vmem:[%s2369_s28] ss:$8 sps:$4 sm:$0xff]   ;;  %v2205_v25 = vld [vmem:[%s2369_s28 + $0x14] ss:$8 sps:$4 sm:$0xff]   ;;  %1170 = vperm.xlu0 %2184, %v1031_v49   ;;  %1180 = vperm.xlu1 %2185, %v1033_v50  }
  0x14   : > { %1922 = vmatprep.mubr.msk.bf16.mxu0 %vm654_vm1, %v2204_v13  ;;  %v2207_v27 = vld [vmem:[%s2369_s28 + $0x10] ss:$8 sps:$4 sm:$0xff]   ;;  %v2208_v28 = vld [vmem:[%s2369_s28 + $0x24] ss:$8 sps:$4 sm:$0xff]   ;;  %v2210_v29 = vld [vmem:[%s2369_s28 + $0x20] ss:$8 sps:$4 sm:$0xff]   ;;  %2076 = vmatpush3.bf16.msra.mxu1 %v2231_v42 }
  0x15   : > { %1976 = vmatpush3.bf16.msra.mxu0 %v2193_v9  ;;  %v2211_v30 = vld [vmem:[%s2369_s28 + $0x34] ss:$8 sps:$4 sm:$0xff]   ;;  %v2213_v31 = vld [vmem:[%s2369_s28 + $0x30] ss:$8 sps:$4 sm:$0xff]   ;;  %v2214_v32 = vld [vmem:[%s2369_s28 + $0x44] ss:$8 sps:$4 sm:$0xff]   ;;  %2077 = vmatprep.subr.bf16.mxu1 %v2255_v8 }
  0x16   : > { %1977 = vmatprep.subr.bf16.mxu0 %v2194_v10  ;;  %v2216_v33 = vld [vmem:[%s2369_s28 + $0x40] ss:$8 sps:$4 sm:$0xff]   ;;  %v2217_v34 = vld [vmem:[%s2369_s28 + $0x54] ss:$8 sps:$4 sm:$0xff]   ;;  %v2219_v35 = vld [vmem:[%s2369_s28 + $0x50] ss:$8 sps:$4 sm:$0xff]  }
  0x17   : > { %v2220_v36 = vld [vmem:[%s2369_s28 + $0x64] ss:$8 sps:$4 sm:$0xff]   ;;  %v2222_v37 = vld [vmem:[%s2369_s28 + $0x60] ss:$8 sps:$4 sm:$0xff]   ;;  %v2223_v38 = vld [vmem:[%s2369_s28 + $0x74] ss:$8 sps:$4 sm:$0xff]   ;;  %1185 = vperm.xlu0 %2184, %v1034_v52   ;;  %1190 = vperm.xlu1 %2185, %v1035_v53  }
  0x18   : > { %v2225_v39 = vld [vmem:[%s2369_s28 + $0x70] ss:$8 sps:$4 sm:$0xff]   ;;  %v2226_v40 = vld [vmem:[%s2369_s28 + $0x84] ss:$8 sps:$4 sm:$0xff]   ;;  %v2228_v41 = vld [vmem:[%s2369_s28 + $0x80] ss:$8 sps:$4 sm:$0xff]   ;;  %2078 = vmatpush3.bf16.msra.mxu1 %v2232_v43 }
  0x19   : > { %1978 = vmatpush3.bf16.msra.mxu0 %v2195_v11  ;;  %2079 = vmatprep.subr.bf16.mxu1 %v2255_v8  ;;  %v1044_v62 = vld [vmem:[%s2758_s6 + $0x70] sm:$0xff]  ;;  %v1045_v63 = vld [vmem:[%s2758_s6 + $0x78] sm:$0xff]  ;;  %v1046_v0 = vld [vmem:[%s2758_s6 + $0x80] sm:$0xff] }
  0x1a   : > { %1979 = vmatprep.subr.bf16.mxu0 %v2196_v12  ;;  %v1047_v1 = vld [vmem:[%s2758_s6 + $0x88] sm:$0xff]  ;;  %v462_v3 = vld [vmem:[%s2754_s2] sm:$0xff]  ;;  %v468_v47 = vld [vmem:[%s2754_s2 + $0x30] sm:$0xff] }
  0x1b   : > { %1195 = vperm.xlu0 %2184, %v1036_v54   ;;  %1200 = vperm.xlu1 %2185, %v1037_v55   ;;  %v463_v7 = vld [vmem:[%s2754_s2 + $0x8] sm:$0xff]  ;;  %v469_v53 = vld [vmem:[%s2754_s2 + $0x38] sm:$0xff] }
  0x1c   : > { %2080 = vmatpush3.bf16.msra.mxu1 %v923_v45 }
  0x1d   : > { %1980 = vmatpush3.bf16.msra.mxu0 %v2197_v16  ;;  %2117 = vmatprep.subr.bf16.mxu1 %v2255_v8  ;;  %v464_v16 = vld [vmem:[%s2754_s2 + $0x10] sm:$0xff] }
  0x1e   : > { %1981 = vmatprep.subr.bf16.mxu0 %v2198_v17 }
  0x1f   : > { %1205 = vperm.xlu0 %2184, %v1038_v56   ;;  %1210 = vperm.xlu1 %2185, %v1039_v57  }
  0x21   : > { %1982 = vmatpush3.bf16.msra.mxu0 %v2199_v20 }
  0x22   : > { %1983 = vmatprep.subr.bf16.mxu0 %v687_v21 }
  0x23   : > { %1215 = vperm.xlu0 %2184, %v1040_v58   ;;  %1220 = vperm.xlu1 %2185, %v1041_v59  }
  0x25   : > { %1984 = vmatpush3.bf16.msra.mxu0 %v2201_v22  ;;  %v2234_v22 = vld [vmem:[%s2759_s7] sm:$0xff]  }
  0x26   : > { %2129 = vmatprep.subr.bf16.mxu0 %v2255_v8 }
  0x27   : > { %1225 = vperm.xlu0 %2184, %v1042_v60   ;;  %1230 = vperm.xlu1 %2185, %v1043_v61  }
  0x28   : > { %722 = vmatmul.mubr.bf16.vlgmr.msra.gmra.mrb[0].mxu0 %v2202_v23  ;;  %v465_v23 = vld [vmem:[%s2754_s2 + $0x18] sm:$0xff] }
  0x29   : > { %1923 = vmatprep.mubr.msk.bf16.mxu0 %vm654_vm1, %v2205_v25  ;;  %2130 = vmatpush3.bf16.msra.mxu0 %v2235_v51 }
  0x2a   : > { %2141 = vmatprep.subr.bf16.mxu0 %v2255_v8 }
  0x2b   : > { %1235 = vperm.xlu0 %2184, %v1044_v62   ;;  %1240 = vperm.xlu1 %2185, %v1045_v63   ;;  %v470_v62 = vld [vmem:[%s2754_s2 + $0x40] sm:$0xff] }
  0x2f   : > { %1245 = vperm.xlu0 %2184, %v1046_v0   ;;  %1250 = vperm.xlu1 %2185, %v1047_v1  }
  0x30   : > { %730 = vmatmul.mubr.bf16.gmra.mrb[4].mxu0 %v2207_v27 }
  0x31   : > { %1924 = vmatprep.mubr.msk.bf16.mxu0 %vm654_vm1, %v2208_v28 }
  0x38   : > { %738 = vmatmul.mubr.bf16.gmra.mrb[8].mxu0 %v2210_v29 }
  0x39   : > { %1925 = vmatprep.mubr.msk.bf16.mxu0 %vm654_vm1, %v2211_v30 }
  0x40   : > { %746 = vmatmul.mubr.bf16.gmra.mrb[12].mxu0 %v2213_v31 }
  0x41   : > { %1926 = vmatprep.mubr.msk.bf16.mxu0 %vm654_vm1, %v2214_v32  ;;  %v466_v32 = vld [vmem:[%s2754_s2 + $0x20] sm:$0xff] }
  0x48   : > { %754 = vmatmul.mubr.bf16.gmra.mrb[16].mxu0 %v2216_v33 }
  0x49   : > { %1927 = vmatprep.mubr.msk.bf16.mxu0 %vm654_vm1, %v2217_v34 }
  0x50   : > { %762 = vmatmul.mubr.bf16.gmra.mrb[20].mxu0 %v2219_v35 }
  0x51   : > { %1928 = vmatprep.mubr.msk.bf16.mxu0 %vm654_vm1, %v2220_v36 }
  0x58   : > { %770 = vmatmul.mubr.bf16.gmra.mrb[24].mxu0 %v2222_v37 }
  0x59   : > { %1929 = vmatprep.mubr.msk.bf16.mxu0 %vm654_vm1, %v2223_v38  ;;  %v467_v38 = vld [vmem:[%s2754_s2 + $0x28] sm:$0xff] }
  0x60   : > { %778 = vmatmul.mubr.bf16.gmra.mrb[28].mxu0 %v2225_v39 }
  0x61   : > { %1930 = vmatprep.mubr.msk.bf16.mxu0 %vm654_vm1, %v2226_v40 }
  0x68   : > { %786 = vmatmul.mubr.bf16.gmra.mrb[32].mxu0 %v2228_v41 }
  0x69   : > { %2131 = vmatprep.mubr.msk.bf16.mxu0 %vm2257_vm4, %v2255_v8 }
  0xfb   : > { %v1985_v2 = vpop.f32.mrb[0].mxu0 }
  0xfc   : > { %v1986_v4 = vpop.f32.mrb[1].mxu0 }
  0xfd   : > { %v1987_v5 = vadd.f32 %v1986_v4, %v1985_v2  ;;  %v1988_v6 = vpop.f32.mrb[2].mxu0  ;;  %v471_v4 = vld [vmem:[%s2754_s2 + $0x48] sm:$0xff] }
  0xfe   : > { %v1989_v9 = vpop.f32.mrb[3].mxu0 }
  0xff   : > { %v724_v10 = vadd.f32 %v1987_v5, %v462_v3  ;;  %v1990_v11 = vadd.f32 %v1989_v9, %v1988_v6 }
 0x101   : > { %v812_v12 = vmul.f32 0.2, %v724_v10  ;;  %v727_v13 = vadd.f32 %v1990_v11, %v463_v7  ;;  %vm794_vm5 = vcmp.ge.f32.partialorder %v724_v10, 0.0 }
 0x103   : > { %vm795_vm6 = vcmp.ge.f32.partialorder %v727_v13, 0.0  ;;  %v813_v14 = vmul.f32 0.2, %v727_v13  ;;  %v1991_v15 = vpop.f32.mrb[4].mxu0  ;;  %v830_v18 = vsel %vm794_vm5, %v724_v10, %v812_v12 }
 0x104   : > { %v1992_v17 = vpop.f32.mrb[5].mxu0 }
 0x105   : > { %v831_v19 = vsel %vm795_vm6, %v727_v13, %v813_v14  ;;  %v1993_v20 = vadd.f32 %v1992_v17, %v1991_v15  ;;  %v1994_v21 = vpop.f32.mrb[6].mxu0  ;;  %v472_v14 = vld [vmem:[%s2754_s2 + $0x50] sm:$0xff] }
 0x106   : > { %v1995_v24 = vpop.f32.mrb[7].mxu0  ;;  %v848_v25 = vpack.c.bf16 %v831_v19, %v830_v18 }
 0x107   : > { %v732_v26 = vadd.f32 %v1993_v20, %v464_v16  ;;  %v1996_v27 = vadd.f32 %v1995_v24, %v1994_v21  ;;  %v473_v20 = vld [vmem:[%s2754_s2 + $0x58] sm:$0xff] }
 0x108   : > { %2082 = vmatmul.mubr.msk.bf16.vlgmr.msra.gmra.mrb[0].mxu1 %vm893_vm7, %v848_v25 }
 0x109   : > { %v814_v28 = vmul.f32 0.2, %v732_v26  ;;  %v735_v29 = vadd.f32 %v1996_v27, %v465_v23  ;;  %2085 = vmatprep.mubr.msk.bf16.mxu1 %vm2257_vm4, %v2255_v8  ;;  %2118 = vmatpush3.bf16.msra.mxu1 %v2234_v22  ;;  %vm796_vm8 = vcmp.ge.f32.partialorder %v732_v26, 0.0 }
 0x10a   : > { %2123 = vmatprep.subr.bf16.mxu1 %v2255_v8 }
 0x10b   : > { %vm797_vm9 = vcmp.ge.f32.partialorder %v735_v29, 0.0  ;;  %v815_v30 = vmul.f32 0.2, %v735_v29  ;;  %v1997_v31 = vpop.f32.mrb[8].mxu0  ;;  %v832_v34 = vsel %vm796_vm8, %v732_v26, %v814_v28 }
 0x10c   : > { %v1998_v33 = vpop.f32.mrb[9].mxu0 }
 0x10d   : > { %v833_v35 = vsel %vm797_vm9, %v735_v29, %v815_v30  ;;  %v1999_v36 = vadd.f32 %v1998_v33, %v1997_v31  ;;  %v2000_v37 = vpop.f32.mrb[10].mxu0  ;;  %v474_v29 = vld [vmem:[%s2754_s2 + $0x60] sm:$0xff] }
 0x10e   : > { %v2001_v39 = vpop.f32.mrb[11].mxu0  ;;  %v849_v40 = vpack.c.bf16 %v833_v35, %v832_v34  ;;  %v475_v35 = vld [vmem:[%s2754_s2 + $0x68] sm:$0xff] }
 0x10f   : > { %v740_v41 = vadd.f32 %v1999_v36, %v466_v32  ;;  %v2002_v42 = vadd.f32 %v2001_v39, %v2000_v37 }
 0x110   : > { %2086 = vmatmul.mubr.msk.bf16.gmra.mrb[4].mxu1 %vm893_vm7, %v849_v40 }
 0x111   : > { %v816_v43 = vmul.f32 0.2, %v740_v41  ;;  %v743_v44 = vadd.f32 %v2002_v42, %v467_v38  ;;  %2089 = vmatprep.mubr.msk.bf16.mxu1 %vm2257_vm4, %v2255_v8  ;;  %vm798_vm10 = vcmp.ge.f32.partialorder %v740_v41, 0.0 }
 0x113   : > { %vm799_vm11 = vcmp.ge.f32.partialorder %v743_v44, 0.0  ;;  %v817_v45 = vmul.f32 0.2, %v743_v44  ;;  %v2003_v46 = vpop.f32.mrb[12].mxu0  ;;  %v834_v49 = vsel %vm798_vm10, %v740_v41, %v816_v43 }
 0x114   : > { %v2004_v48 = vpop.f32.mrb[13].mxu0 }
 0x115   : > { %v835_v50 = vsel %vm799_vm11, %v743_v44, %v817_v45  ;;  %v2005_v51 = vadd.f32 %v2004_v48, %v2003_v46  ;;  %v2006_v52 = vpop.f32.mrb[14].mxu0  ;;  %v476_v44 = vld [vmem:[%s2754_s2 + $0x70] sm:$0xff]  ;;  %vm1304_vm11 = vcmask 130048  }
 0x116   : > { %v2007_v54 = vpop.f32.mrb[15].mxu0  ;;  %v850_v55 = vpack.c.bf16 %v835_v50, %v834_v49  ;;  %v477_v50 = vld [vmem:[%s2754_s2 + $0x78] sm:$0xff] }
 0x117   : > { %v748_v56 = vadd.f32 %v2005_v51, %v468_v47  ;;  %v2008_v57 = vadd.f32 %v2007_v54, %v2006_v52 }
 0x118   : > { %2090 = vmatmul.mubr.msk.bf16.gmra.mrb[8].mxu1 %vm893_vm7, %v850_v55 }
 0x119   : > { %v818_v58 = vmul.f32 0.2, %v748_v56  ;;  %v751_v59 = vadd.f32 %v2008_v57, %v469_v53  ;;  %2093 = vmatprep.mubr.msk.bf16.mxu1 %vm2257_vm4, %v2255_v8  ;;  %vm800_vm12 = vcmp.ge.f32.partialorder %v748_v56, 0.0 }
 0x11b   : > { %vm801_vm13 = vcmp.ge.f32.partialorder %v751_v59, 0.0  ;;  %v819_v60 = vmul.f32 0.2, %v751_v59  ;;  %v2009_v61 = vpop.f32.mrb[16].mxu0  ;;  %v836_v0 = vsel %vm800_vm12, %v748_v56, %v818_v58 }
 0x11c   : > { %v2010_v63 = vpop.f32.mrb[17].mxu0 }
 0x11d   : > { %v837_v1 = vsel %vm801_vm13, %v751_v59, %v819_v60  ;;  %v2011_v2 = vadd.f32 %v2010_v63, %v2009_v61  ;;  %v2012_v3 = vpop.f32.mrb[18].mxu0  ;;  %v478_v59 = vld [vmem:[%s2754_s2 + $0x80] sm:$0xff] }
 0x11e   : > { %v2013_v5 = vpop.f32.mrb[19].mxu0  ;;  %v851_v6 = vpack.c.bf16 %v837_v1, %v836_v0  ;;  %v479_v1 = vld [vmem:[%s2754_s2 + $0x88] sm:$0xff] }
 0x11f   : > { %v756_v7 = vadd.f32 %v2011_v2, %v470_v62  ;;  %v2014_v9 = vadd.f32 %v2013_v5, %v2012_v3 }
 0x120   : > { %2094 = vmatmul.mubr.msk.bf16.gmra.mrb[12].mxu1 %vm893_vm7, %v851_v6 }
 0x121   : > { %v820_v10 = vmul.f32 0.2, %v756_v7  ;;  %v759_v11 = vadd.f32 %v2014_v9, %v471_v4  ;;  %2097 = vmatprep.mubr.msk.bf16.mxu1 %vm2257_vm4, %v2255_v8  ;;  %vm802_vm14 = vcmp.ge.f32.partialorder %v756_v7, 0.0 }
 0x123   : > { %vm803_vm15 = vcmp.ge.f32.partialorder %v759_v11, 0.0  ;;  %v821_v12 = vmul.f32 0.2, %v759_v11  ;;  %v2015_v13 = vpop.f32.mrb[20].mxu0  ;;  %v838_v16 = vsel %vm802_vm14, %v756_v7, %v820_v10 }
 0x124   : > { %v2016_v15 = vpop.f32.mrb[21].mxu0 }
 0x125   : > { %v839_v17 = vsel %vm803_vm15, %v759_v11, %v821_v12  ;;  %v2017_v18 = vadd.f32 %v2016_v15, %v2015_v13  ;;  %v2018_v19 = vpop.f32.mrb[22].mxu0  ;;  %v2590_v13 = vld [vmem:[%s2756_s4] ss:$0 sm:$0xff] }
 0x126   : > { %v2019_v21 = vpop.f32.mrb[23].mxu0  ;;  %v852_v22 = vpack.c.bf16 %v839_v17, %v838_v16  ;;  %v1073_v15 = vld [vmem:[%s2757_s5] sm:$0xff] }
 0x127   : > { %v764_v23 = vadd.f32 %v2017_v18, %v472_v14  ;;  %v2020_v24 = vadd.f32 %v2019_v21, %v2018_v19  ;;  %v1074_v19 = vld [vmem:[%s2757_s5 + $0x8] sm:$0xff] }
 0x128   : > { %2098 = vmatmul.mubr.msk.bf16.gmra.mrb[16].mxu1 %vm893_vm7, %v852_v22  ;;  %v1166_v22 = vpop.permute.xlu0 %1165 }
 0x129   : > { %v822_v25 = vmul.f32 0.2, %v764_v23  ;;  %v767_v26 = vadd.f32 %v2020_v24, %v473_v20  ;;  %2101 = vmatprep.mubr.msk.bf16.mxu1 %vm2257_vm4, %v2255_v8  ;;  %vm804_vm0 = vcmp.ge.f32.partialorder %v764_v23, 0.0 }
 0x12b   : > { %vm805_vm1 = vcmp.ge.f32.partialorder %v767_v26, 0.0  ;;  %v823_v27 = vmul.f32 0.2, %v767_v26  ;;  %v2021_v28 = vpop.f32.mrb[24].mxu0  ;;  %v840_v31 = vsel %vm804_vm0, %v764_v23, %v822_v25 }
 0x12c   : > { %v2022_v30 = vpop.f32.mrb[25].mxu0 }
 0x12d   : > { %v841_v32 = vsel %vm805_vm1, %v767_v26, %v823_v27  ;;  %v2023_v33 = vadd.f32 %v2022_v30, %v2021_v28  ;;  %v2024_v34 = vpop.f32.mrb[26].mxu0  ;;  %v1171_v30 = vpop.permute.xlu0 %1170 }
 0x12e   : > { %v2025_v36 = vpop.f32.mrb[27].mxu0  ;;  %v853_v37 = vpack.c.bf16 %v841_v32, %v840_v31 }
 0x12f   : > { %v772_v38 = vadd.f32 %v2023_v33, %v474_v29  ;;  %v2026_v39 = vadd.f32 %v2025_v36, %v2024_v34  ;;  %v1075_v29 = vld [vmem:[%s2757_s5 + $0x10] sm:$0xff] }
 0x130   : > { %2102 = vmatmul.mubr.msk.bf16.gmra.mrb[20].mxu1 %vm893_vm7, %v853_v37  ;;  %v1076_v37 = vld [vmem:[%s2757_s5 + $0x18] sm:$0xff] }
 0x131   : > { %v824_v40 = vmul.f32 0.2, %v772_v38  ;;  %v775_v41 = vadd.f32 %v2026_v39, %v475_v35  ;;  %2105 = vmatprep.mubr.msk.bf16.mxu1 %vm2257_vm4, %v2255_v8  ;;  %vm806_vm2 = vcmp.ge.f32.partialorder %v772_v38, 0.0  ;;  %v1176_v39 = vpop.permute.xlu1 %1175 }
 0x133   : > { %vm807_vm3 = vcmp.ge.f32.partialorder %v775_v41, 0.0  ;;  %v825_v42 = vmul.f32 0.2, %v775_v41  ;;  %v2027_v43 = vpop.f32.mrb[28].mxu0  ;;  %v842_v46 = vsel %vm806_vm2, %v772_v38, %v824_v40 }
 0x134   : > { %v2028_v45 = vpop.f32.mrb[29].mxu0 }
 0x135   : > { %v843_v47 = vsel %vm807_vm3, %v775_v41, %v825_v42  ;;  %v2029_v48 = vadd.f32 %v2028_v45, %v2027_v43  ;;  %v2030_v49 = vpop.f32.mrb[30].mxu0  ;;  %v2236_v42 = vld [vmem:[%s2759_s7 + $0x8] sm:$0xff]  }
 0x136   : > { %v2031_v51 = vpop.f32.mrb[31].mxu0  ;;  %v854_v52 = vpack.c.bf16 %v843_v47, %v842_v46 }
 0x137   : > { %v780_v53 = vadd.f32 %v2029_v48, %v476_v44  ;;  %v2032_v54 = vadd.f32 %v2031_v51, %v2030_v49  ;;  %v1077_v49 = vld [vmem:[%s2757_s5 + $0x20] sm:$0xff] }
 0x138   : > { %2106 = vmatmul.mubr.msk.bf16.gmra.mrb[24].mxu1 %vm893_vm7, %v854_v52 }
 0x139   : > { %v826_v55 = vmul.f32 0.2, %v780_v53  ;;  %v783_v56 = vadd.f32 %v2032_v54, %v477_v50  ;;  %2109 = vmatprep.mubr.msk.bf16.mxu1 %vm2257_vm4, %v2255_v8  ;;  %vm808_vm5 = vcmp.ge.f32.partialorder %v780_v53, 0.0  ;;  %v1181_v50 = vpop.permute.xlu1 %1180 }
 0x13b   : > { %vm809_vm6 = vcmp.ge.f32.partialorder %v783_v56, 0.0  ;;  %v827_v57 = vmul.f32 0.2, %v783_v56  ;;  %v2033_v58 = vpop.f32.mrb[32].mxu0  ;;  %v844_v61 = vsel %vm808_vm5, %v780_v53, %v826_v55 }
 0x13c   : > { %v2034_v60 = vpop.f32.mrb[33].mxu0 }
 0x13d   : > { %v845_v62 = vsel %vm809_vm6, %v783_v56, %v827_v57  ;;  %v2035_v63 = vadd.f32 %v2034_v60, %v2033_v58  ;;  %v2036_v0 = vpop.f32.mrb[34].mxu0  ;;  %v1078_v57 = vld [vmem:[%s2757_s5 + $0x28] sm:$0xff] }
 0x13e   : > { %v2037_v2 = vpop.f32.mrb[35].mxu0  ;;  %v855_v3 = vpack.c.bf16 %v845_v62, %v844_v61  ;;  %v2237_v61 = vld [vmem:[%s2759_s7 + $0x18] sm:$0xff]  }
 0x13f   : > { %v788_v4 = vadd.f32 %v2035_v63, %v478_v59  ;;  %v2038_v5 = vadd.f32 %v2037_v2, %v2036_v0 }
 0x140   : > { %2110 = vmatmul.mubr.msk.bf16.gmra.mrb[28].mxu1 %vm893_vm7, %v855_v3  ;;  %v1186_v3 = vpop.permute.xlu0 %1185 }
 0x141   : > { %v828_v6 = vmul.f32 0.2, %v788_v4  ;;  %v791_v7 = vadd.f32 %v2038_v5, %v479_v1  ;;  %2113 = vmatprep.mubr.msk.bf16.mxu1 %vm2257_vm4, %v2255_v8  ;;  %vm810_vm8 = vcmp.ge.f32.partialorder %v788_v4, 0.0  ;;  %v1079_v5 = vld [vmem:[%s2757_s5 + $0x30] sm:$0xff] }
 0x143   : > { %vm811_vm9 = vcmp.ge.f32.partialorder %v791_v7, 0.0  ;;  %v829_v9 = vmul.f32 0.2, %v791_v7  ;;  %v846_v10 = vsel %vm810_vm8, %v788_v4, %v828_v6  ;;  %v1191_v6 = vpop.permute.xlu1 %1190 }
 0x145   : > { %v847_v11 = vsel %vm811_vm9, %v791_v7, %v829_v9 }
 0x146   : > { %v856_v12 = vpack.c.bf16 %v847_v11, %v846_v10 }
 0x148   : > { %2114 = vmatmul.mubr.msk.bf16.gmra.mrb[32].mxu1 %vm893_vm7, %v856_v12 }
 0x149   : > { %2119 = vmatprep.mubr.msk.bf16.mxu1 %vm2257_vm4, %v2255_v8 }
 0x1db   : > { %v959_v14 = vpop.f32.mrb[0].mxu1 }
 0x1dc   : > { %v1055_v16 = vmul.f32 %v2590_v13, %v959_v14  ;;  %v2083_v17 = vpop.f32.mrb[1].mxu1 }
 0x1dd   : > { %v962_v18 = vpop.f32.mrb[2].mxu1 }
 0x1de   : > { %v1091_v20 = vadd.f32 %v1073_v15, %v1055_v16  ;;  %v1056_v21 = vmul.f32 %v2590_v13, %v962_v18  ;;  %v2084_v23 = vpop.f32.mrb[3].mxu1  ;;  %v1080_v15 = vld [vmem:[%s2757_s5 + $0x38] sm:$0xff] }
 0x1e0   : > { %v1092_v24 = vadd.f32 %v1074_v19, %v1056_v21  ;;  %vm1109_vm7 = vcmp.ge.f32.partialorder %v1091_v20, 0.0  ;;  %v1127_v25 = vmul.f32 0.2, %v1091_v20  ;;  %v2238_v19 = vld [vmem:[%s2759_s7 + $0x20] sm:$0xff]  }
 0x1e2   : > { %v1145_v26 = vsel %vm1109_vm7, %v1091_v20, %v1127_v25  ;;  %vm1110_vm10 = vcmp.ge.f32.partialorder %v1092_v24, 0.0  ;;  %v1128_v27 = vmul.f32 0.2, %v1092_v24  ;;  %v1196_v25 = vpop.permute.xlu0 %1195 }
 0x1e3   : > { %v967_v28 = vpop.f32.mrb[4].mxu1  ;;  %v1253_v34 = vmul.f32 %v1166_v22, %v1145_v26 }
 0x1e4   : > { %v1146_v31 = vsel %vm1110_vm10, %v1092_v24, %v1128_v27  ;;  %v1057_v32 = vmul.f32 %v2590_v13, %v967_v28  ;;  %v2087_v33 = vpop.f32.mrb[5].mxu1  ;;  %v1081_v27 = vld [vmem:[%s2757_s5 + $0x40] sm:$0xff]  ;;  %v1201_v28 = vpop.permute.xlu1 %1200 }
 0x1e5   : > { %v1254_v35 = vmul.f32 %v1171_v30, %v1146_v31  ;;  %v970_v36 = vpop.f32.mrb[6].mxu1 }
 0x1e6   : > { %v1093_v38 = vadd.f32 %v1075_v29, %v1057_v32  ;;  %v1058_v40 = vmul.f32 %v2590_v13, %v970_v36  ;;  %v2088_v41 = vpop.f32.mrb[7].mxu1 }
 0x1e7   : > { %v1271_v43 = vpack.c.bf16 %v1254_v35, %v1253_v34  ;;  %v1082_v35 = vld [vmem:[%s2757_s5 + $0x48] sm:$0xff] }
 0x1e8   : > { %vm1111_vm12 = vcmp.ge.f32.partialorder %v1093_v38, 0.0  ;;  %v1129_v44 = vmul.f32 0.2, %v1093_v38  ;;  %v1094_v45 = vadd.f32 %v1076_v37, %v1058_v40 }
 0x1e9   : > { %2120 = vmatmul.mubr.msk.bf16.vlgmr.msra.gmra.mrb[36].mxu1 %vm1304_vm11, %v1271_v43 }
 0x1ea   : > { %v1147_v46 = vsel %vm1111_vm12, %v1093_v38, %v1129_v44  ;;  %vm1112_vm13 = vcmp.ge.f32.partialorder %v1094_v45, 0.0  ;;  %v1130_v47 = vmul.f32 0.2, %v1094_v45  ;;  %2124 = vmatpush3.bf16.msra.mxu1 %v2236_v42  ;;  %2125 = vmatprep.mubr.msk.bf16.mxu1 %vm2257_vm4, %v2255_v8 }
 0x1eb   : > { %v975_v48 = vpop.f32.mrb[8].mxu1  ;;  %2135 = vmatprep.subr.bf16.mxu1 %v2255_v8  ;;  %v1255_v54 = vmul.f32 %v1176_v39, %v1147_v46  ;;  %v2239_v39 = vld [vmem:[%s2759_s7 + $0x28] sm:$0xff]  }
 0x1ec   : > { %v1148_v51 = vsel %vm1112_vm13, %v1094_v45, %v1130_v47  ;;  %v1059_v52 = vmul.f32 %v2590_v13, %v975_v48  ;;  %v2091_v53 = vpop.f32.mrb[9].mxu1  ;;  %v1206_v45 = vpop.permute.xlu0 %1205  ;;  %v1083_v47 = vld [vmem:[%s2757_s5 + $0x50] sm:$0xff]  ;;  %vm1749_vm13 = vcmask 261120  }
 0x1ed   : > { %v1256_v55 = vmul.f32 %v1181_v50, %v1148_v51  ;;  %v978_v56 = vpop.f32.mrb[10].mxu1  ;;  %v1211_v48 = vpop.permute.xlu1 %1210 }
 0x1ee   : > { %v1095_v58 = vadd.f32 %v1077_v49, %v1059_v52  ;;  %v1060_v59 = vmul.f32 %v2590_v13, %v978_v56  ;;  %v2092_v60 = vpop.f32.mrb[11].mxu1 }
 0x1ef   : > { %v1272_v62 = vpack.c.bf16 %v1256_v55, %v1255_v54  ;;  %v1084_v55 = vld [vmem:[%s2757_s5 + $0x58] sm:$0xff] }
 0x1f0   : > { %vm1113_vm14 = vcmp.ge.f32.partialorder %v1095_v58, 0.0  ;;  %v1131_v63 = vmul.f32 0.2, %v1095_v58  ;;  %v1096_v0 = vadd.f32 %v1078_v57, %v1060_v59  ;;  %v2240_v59 = vld [vmem:[%s2759_s7 + $0x30] sm:$0xff]  }
 0x1f1   : > { %2126 = vmatmul.mubr.msk.bf16.vlgmr.msra.gmra.mrb[40].mxu1 %vm1304_vm11, %v1272_v62 }
 0x1f2   : > { %v1149_v1 = vsel %vm1113_vm14, %v1095_v58, %v1131_v63  ;;  %vm1114_vm15 = vcmp.ge.f32.partialorder %v1096_v0, 0.0  ;;  %v1132_v2 = vmul.f32 0.2, %v1096_v0  ;;  %2136 = vmatpush3.bf16.msra.mxu1 %v2237_v61  ;;  %2137 = vmatprep.mubr.msk.bf16.mxu1 %vm2257_vm4, %v2255_v8 }
 0x1f3   : > { %v983_v4 = vpop.f32.mrb[12].mxu1  ;;  %2147 = vmatprep.subr.bf16.mxu1 %v2255_v8  ;;  %v1257_v11 = vmul.f32 %v1186_v3, %v1149_v1  ;;  %v1216_v1 = vpop.permute.xlu0 %1215  ;;  %v1085_v3 = vld [vmem:[%s2757_s5 + $0x60] sm:$0xff] }
 0x1f4   : > { %v1150_v7 = vsel %vm1114_vm15, %v1096_v0, %v1132_v2  ;;  %v1061_v9 = vmul.f32 %v2590_v13, %v983_v4  ;;  %v2095_v10 = vpop.f32.mrb[13].mxu1  ;;  %v1221_v4 = vpop.permute.xlu1 %1220  ;;  %vm1833_vm15 = vcmask 0  }
 0x1f5   : > { %v1258_v12 = vmul.f32 %v1191_v6, %v1150_v7  ;;  %v986_v14 = vpop.f32.mrb[14].mxu1 }
 0x1f6   : > { %v1097_v16 = vadd.f32 %v1079_v5, %v1061_v9  ;;  %v1062_v17 = vmul.f32 %v2590_v13, %v986_v14  ;;  %v2096_v18 = vpop.f32.mrb[15].mxu1 }
 0x1f7   : > { %v1273_v20 = vpack.c.bf16 %v1258_v12, %v1257_v11  ;;  %v1086_v12 = vld [vmem:[%s2757_s5 + $0x68] sm:$0xff] }
 0x1f8   : > { %vm1115_vm0 = vcmp.ge.f32.partialorder %v1097_v16, 0.0  ;;  %v1133_v21 = vmul.f32 0.2, %v1097_v16  ;;  %v1098_v22 = vadd.f32 %v1080_v15, %v1062_v17  ;;  %v2241_v17 = vld [vmem:[%s2759_s7 + $0x38] sm:$0xff]  }
 0x1f9   : > { %2132 = vmatmul.mubr.msk.bf16.vlgmr.msra.gmra.mrb[36].mxu0 %vm1304_vm11, %v1273_v20 }
 0x1fa   : > { %v1151_v23 = vsel %vm1115_vm0, %v1097_v16, %v1133_v21  ;;  %vm1116_vm1 = vcmp.ge.f32.partialorder %v1098_v22, 0.0  ;;  %v1134_v24 = vmul.f32 0.2, %v1098_v22  ;;  %2142 = vmatpush3.bf16.msra.mxu0 %v2238_v19  ;;  %2143 = vmatprep.mubr.msk.bf16.mxu0 %vm2257_vm4, %v2255_v8 }
 0x1fb   : > { %v991_v26 = vpop.f32.mrb[16].mxu1  ;;  %2153 = vmatprep.subr.bf16.mxu0 %v2255_v8  ;;  %v1259_v32 = vmul.f32 %v1196_v25, %v1151_v23  ;;  %v1226_v23 = vpop.permute.xlu0 %1225  ;;  %v1087_v25 = vld [vmem:[%s2757_s5 + $0x70] sm:$0xff] }
 0x1fc   : > { %v1152_v29 = vsel %vm1116_vm1, %v1098_v22, %v1134_v24  ;;  %v1063_v30 = vmul.f32 %v2590_v13, %v991_v26  ;;  %v2099_v31 = vpop.f32.mrb[17].mxu1  ;;  %v1231_v26 = vpop.permute.xlu1 %1230 }
 0x1fd   : > { %v1260_v33 = vmul.f32 %v1201_v28, %v1152_v29  ;;  %v994_v34 = vpop.f32.mrb[18].mxu1 }
 0x1fe   : > { %v1099_v36 = vadd.f32 %v1081_v27, %v1063_v30  ;;  %v1064_v37 = vmul.f32 %v2590_v13, %v994_v34  ;;  %v2100_v38 = vpop.f32.mrb[19].mxu1 }
 0x1ff   : > { %v1274_v40 = vpack.c.bf16 %v1260_v33, %v1259_v32  ;;  %v1088_v33 = vld [vmem:[%s2757_s5 + $0x78] sm:$0xff] }
 0x200   : > { %vm1117_vm2 = vcmp.ge.f32.partialorder %v1099_v36, 0.0  ;;  %v1135_v41 = vmul.f32 0.2, %v1099_v36  ;;  %v1100_v42 = vadd.f32 %v1082_v35, %v1064_v37  ;;  %v2242_v37 = vld [vmem:[%s2759_s7 + $0x40] sm:$0xff]  }
 0x201   : > { %2138 = vmatmul.mubr.msk.bf16.vlgmr.msra.gmra.mrb[44].mxu1 %vm1304_vm11, %v1274_v40 }
 0x202   : > { %v1153_v43 = vsel %vm1117_vm2, %v1099_v36, %v1135_v41  ;;  %vm1118_vm3 = vcmp.ge.f32.partialorder %v1100_v42, 0.0  ;;  %v1136_v44 = vmul.f32 0.2, %v1100_v42  ;;  %2148 = vmatpush3.bf16.msra.mxu1 %v2239_v39  ;;  %2149 = vmatprep.mubr.msk.bf16.mxu1 %vm2257_vm4, %v2255_v8 }
 0x203   : > { %v999_v46 = vpop.f32.mrb[20].mxu1  ;;  %2159 = vmatprep.subr.bf16.mxu1 %v2255_v8  ;;  %v1261_v52 = vmul.f32 %v1206_v45, %v1153_v43  ;;  %v1236_v43 = vpop.permute.xlu0 %1235  ;;  %v1089_v45 = vld [vmem:[%s2757_s5 + $0x80] sm:$0xff] }
 0x204   : > { %v1154_v49 = vsel %vm1118_vm3, %v1100_v42, %v1136_v44  ;;  %v1065_v50 = vmul.f32 %v2590_v13, %v999_v46  ;;  %v2103_v51 = vpop.f32.mrb[21].mxu1  ;;  %v1241_v46 = vpop.permute.xlu1 %1240 }
 0x205   : > { %v1262_v53 = vmul.f32 %v1211_v48, %v1154_v49  ;;  %v1002_v54 = vpop.f32.mrb[22].mxu1 }
 0x206   : > { %v1101_v56 = vadd.f32 %v1083_v47, %v1065_v50  ;;  %v1066_v57 = vmul.f32 %v2590_v13, %v1002_v54  ;;  %v2104_v58 = vpop.f32.mrb[23].mxu1 }
 0x207   : > { %v1275_v60 = vpack.c.bf16 %v1262_v53, %v1261_v52  ;;  %v1090_v53 = vld [vmem:[%s2757_s5 + $0x88] sm:$0xff] }
 0x208   : > { %vm1119_vm5 = vcmp.ge.f32.partialorder %v1101_v56, 0.0  ;;  %v1137_v61 = vmul.f32 0.2, %v1101_v56  ;;  %v1102_v62 = vadd.f32 %v1084_v55, %v1066_v57 }
 0x209   : > { %2144 = vmatmul.mubr.msk.bf16.vlgmr.msra.gmra.mrb[40].mxu0 %vm1304_vm11, %v1275_v60 }
 0x20a   : > { %v1155_v63 = vsel %vm1119_vm5, %v1101_v56, %v1137_v61  ;;  %vm1120_vm6 = vcmp.ge.f32.partialorder %v1102_v62, 0.0  ;;  %v1138_v0 = vmul.f32 0.2, %v1102_v62  ;;  %2154 = vmatpush3.bf16.msra.mxu0 %v2240_v59  ;;  %2155 = vmatprep.mubr.msk.bf16.mxu0 %vm2257_vm4, %v2255_v8  ;;  %v1246_v61 = vpop.permute.xlu0 %1245 }
 0x20b   : > { %v1007_v2 = vpop.f32.mrb[24].mxu1  ;;  %2165 = vmatprep.subr.bf16.mxu0 %v2255_v8  ;;  %v1263_v9 = vmul.f32 %v1216_v1, %v1155_v63 }
 0x20c   : > { %v1156_v5 = vsel %vm1120_vm6, %v1102_v62, %v1138_v0  ;;  %v1067_v6 = vmul.f32 %v2590_v13, %v1007_v2  ;;  %v2107_v7 = vpop.f32.mrb[25].mxu1  ;;  %v1251_v62 = vpop.permute.xlu1 %1250 }
 0x20d   : > { %v1264_v10 = vmul.f32 %v1221_v4, %v1156_v5  ;;  %v1010_v11 = vpop.f32.mrb[26].mxu1 }
 0x20e   : > { %v1103_v14 = vadd.f32 %v1085_v3, %v1067_v6  ;;  %v1068_v15 = vmul.f32 %v2590_v13, %v1010_v11  ;;  %v2108_v16 = vpop.f32.mrb[27].mxu1 }
 0x20f   : > { %v1276_v18 = vpack.c.bf16 %v1264_v10, %v1263_v9 }
 0x210   : > { %vm1121_vm8 = vcmp.ge.f32.partialorder %v1103_v14, 0.0  ;;  %v1139_v19 = vmul.f32 0.2, %v1103_v14  ;;  %v1104_v20 = vadd.f32 %v1086_v12, %v1068_v15 }
 0x211   : > { %2150 = vmatmul.mubr.msk.bf16.vlgmr.msra.gmra.mrb[48].mxu1 %vm1304_vm11, %v1276_v18 }
 0x212   : > { %v1157_v21 = vsel %vm1121_vm8, %v1103_v14, %v1139_v19  ;;  %vm1122_vm9 = vcmp.ge.f32.partialorder %v1104_v20, 0.0  ;;  %v1140_v22 = vmul.f32 0.2, %v1104_v20  ;;  %2160 = vmatpush3.bf16.msra.mxu1 %v2241_v17  ;;  %2161 = vmatprep.mubr.msk.bf16.mxu1 %vm2257_vm4, %v2255_v8 }
 0x213   : > { %v1015_v24 = vpop.f32.mrb[28].mxu1  ;;  %v1265_v30 = vmul.f32 %v1226_v23, %v1157_v21 }
 0x214   : > { %v1158_v27 = vsel %vm1122_vm9, %v1104_v20, %v1140_v22  ;;  %v1069_v28 = vmul.f32 %v2590_v13, %v1015_v24  ;;  %v2111_v29 = vpop.f32.mrb[29].mxu1 }
 0x215   : > { %v1266_v31 = vmul.f32 %v1231_v26, %v1158_v27  ;;  %v1018_v32 = vpop.f32.mrb[30].mxu1 }
 0x216   : > { %v1105_v34 = vadd.f32 %v1087_v25, %v1069_v28  ;;  %v1070_v35 = vmul.f32 %v2590_v13, %v1018_v32  ;;  %v2112_v36 = vpop.f32.mrb[31].mxu1 }
 0x217   : > { %v1277_v38 = vpack.c.bf16 %v1266_v31, %v1265_v30 }
 0x218   : > { %vm1123_vm7 = vcmp.ge.f32.partialorder %v1105_v34, 0.0  ;;  %v1141_v39 = vmul.f32 0.2, %v1105_v34  ;;  %v1106_v40 = vadd.f32 %v1088_v33, %v1070_v35 }
 0x219   : > { %2156 = vmatmul.mubr.msk.bf16.vlgmr.msra.gmra.mrb[44].mxu0 %vm1304_vm11, %v1277_v38 }
 0x21a   : > { %v1159_v41 = vsel %vm1123_vm7, %v1105_v34, %v1141_v39  ;;  %vm1124_vm10 = vcmp.ge.f32.partialorder %v1106_v40, 0.0  ;;  %v1142_v42 = vmul.f32 0.2, %v1106_v40  ;;  %2166 = vmatpush3.bf16.msra.mxu0 %v2242_v37  ;;  %2167 = vmatprep.mubr.msk.bf16.mxu0 %vm2257_vm4, %v2255_v8 }
 0x21b   : > { %v1023_v44 = vpop.f32.mrb[32].mxu1  ;;  %v1267_v50 = vmul.f32 %v1236_v43, %v1159_v41 }
 0x21c   : > { %v1160_v47 = vsel %vm1124_vm10, %v1106_v40, %v1142_v42  ;;  %v1071_v48 = vmul.f32 %v2590_v13, %v1023_v44  ;;  %v2115_v49 = vpop.f32.mrb[33].mxu1 }
 0x21d   : > { %v1268_v51 = vmul.f32 %v1241_v46, %v1160_v47  ;;  %v1026_v52 = vpop.f32.mrb[34].mxu1 }
 0x21e   : > { %v1107_v54 = vadd.f32 %v1089_v45, %v1071_v48  ;;  %v1072_v8 = vmul.f32 %v2590_v13, %v1026_v52  ;;  %v2116_v55 = vpop.f32.mrb[35].mxu1 }
 0x21f   : > { %v1278_v56 = vpack.c.bf16 %v1268_v51, %v1267_v50 }
 0x220   : > { %vm1125_vm4 = vcmp.ge.f32.partialorder %v1107_v54, 0.0  ;;  %v1143_v57 = vmul.f32 0.2, %v1107_v54  ;;  %v1108_v58 = vadd.f32 %v1090_v53, %v1072_v8 }
 0x221   : > { %2162 = vmatmul.mubr.msk.bf16.vlgmr.msra.gmra.mrb[52].mxu1 %vm1304_vm11, %v1278_v56 }
 0x222   : > { %v1161_v59 = vsel %vm1125_vm4, %v1107_v54, %v1143_v57  ;;  %vm1126_vm12 = vcmp.ge.f32.partialorder %v1108_v58, 0.0  ;;  %v1144_v60 = vmul.f32 0.2, %v1108_v58 }
 0x223   : > { %v1269_v0 = vmul.f32 %v1246_v61, %v1161_v59 }
 0x224   : > { %v1162_v63 = vsel %vm1126_vm12, %v1108_v58, %v1144_v60 }
 0x225   : > { %v1270_v1 = vmul.f32 %v1251_v62, %v1162_v63 }
 0x227   : > { %v1279_v2 = vpack.c.bf16 %v1270_v1, %v1269_v0 }
 0x229   : > { %2168 = vmatmul.mubr.msk.bf16.vlgmr.msra.gmra.mrb[48].mxu0 %vm1304_vm11, %v1279_v2 }
 0x2bc   : > { %v1342_v3 = vpop.f32.mrb[36].mxu1 }
 0x2bd   : > { %v2121_v13 = vpop.f32.mrb[37].mxu1  ;;  %v1750_v7 = vsel %vm1749_vm13, %v1342_v3, 0.0  ;;  %v1964_v3 = vld [vmem:[%s2760_s8] ss:$0 sm:$0xff] }
 0x2be   : > { %v1345_v4 = vpop.f32.mrb[38].mxu1 }
 0x2bf   : > { %v2122_v5 = vpop.f32.mrb[39].mxu1  ;;  %v1767_v14 = vsel %vm1749_vm13, %v1345_v4, 0.0 }
 0x2c4   : > { %v1392_v6 = vpop.f32.mrb[40].mxu1 }
 0x2c5   : > { %v1751_v9 = vsel %vm1749_vm13, %v1392_v6, 0.0  ;;  %v2127_v10 = vpop.f32.mrb[41].mxu1  ;;  %v1965_v6 = vld [vmem:[%s2761_s9] ss:$0 sm:$0xff] }
 0x2c6   : > { %v1752_v11 = vadd.f32 %v1751_v9, %v1750_v7  ;;  %v1395_v12 = vpop.f32.mrb[42].mxu1 }
 0x2c7   : > { %v1768_v15 = vsel %vm1749_vm13, %v1395_v12, 0.0  ;;  %v2128_v16 = vpop.f32.mrb[43].mxu1 }
 0x2c8   : > { %v1769_v17 = vadd.f32 %v1768_v15, %v1767_v14 }
 0x2cc   : > { %v1442_v18 = vpop.f32.mrb[36].mxu0 }
 0x2cd   : > { %v1753_v19 = vsel %vm1749_vm13, %v1442_v18, 0.0  ;;  %v2133_v20 = vpop.f32.mrb[37].mxu0 }
 0x2ce   : > { %v1754_v21 = vadd.f32 %v1753_v19, %v1752_v11  ;;  %v1445_v22 = vpop.f32.mrb[38].mxu0  ;;  %v1809_v20 = vld [vmem:[%s2762_s10 + $0x8] sm:$0xff] }
 0x2cf   : > { %v1770_v23 = vsel %vm1749_vm13, %v1445_v22, 0.0  ;;  %v2134_v24 = vpop.f32.mrb[39].mxu0 }
 0x2d0   : > { %v1771_v25 = vadd.f32 %v1770_v23, %v1769_v17  ;;  %v1808_v17 = vld [vmem:[%s2762_s10] sm:$0xff] }
 0x2d4   : > { %v1492_v26 = vpop.f32.mrb[44].mxu1 }
 0x2d5   : > { %v1755_v27 = vsel %vm1749_vm13, %v1492_v26, 0.0  ;;  %v2139_v28 = vpop.f32.mrb[45].mxu1 }
 0x2d6   : > { %v1756_v29 = vadd.f32 %v1755_v27, %v1754_v21  ;;  %v1495_v30 = vpop.f32.mrb[46].mxu1 }
 0x2d7   : > { %v1772_v31 = vsel %vm1749_vm13, %v1495_v30, 0.0  ;;  %v2140_v32 = vpop.f32.mrb[47].mxu1 }
 0x2d8   : > { %v1773_v33 = vadd.f32 %v1772_v31, %v1771_v25 }
 0x2dc   : > { %v1542_v34 = vpop.f32.mrb[40].mxu0 }
 0x2dd   : > { %v1757_v35 = vsel %vm1749_vm13, %v1542_v34, 0.0  ;;  %v2145_v36 = vpop.f32.mrb[41].mxu0  ;;  %v1825_v34 = vld [vmem:[#allocation2] sm:$0x1] }
 0x2de   : > { %v1758_v37 = vadd.f32 %v1757_v35, %v1756_v29  ;;  %v1545_v38 = vpop.f32.mrb[42].mxu0 }
 0x2df   : > { %v1774_v39 = vsel %vm1749_vm13, %v1545_v38, 0.0  ;;  %v2146_v40 = vpop.f32.mrb[43].mxu0 }
 0x2e0   : > { %v1775_v41 = vadd.f32 %v1774_v39, %v1773_v33 }
 0x2e4   : > { %v1592_v42 = vpop.f32.mrb[48].mxu1 }
 0x2e5   : > { %v1759_v43 = vsel %vm1749_vm13, %v1592_v42, 0.0  ;;  %v2151_v44 = vpop.f32.mrb[49].mxu1 }
 0x2e6   : > { %v1760_v45 = vadd.f32 %v1759_v43, %v1758_v37  ;;  %v1595_v46 = vpop.f32.mrb[50].mxu1 }
 0x2e7   : > { %v1776_v47 = vsel %vm1749_vm13, %v1595_v46, 0.0  ;;  %v2152_v48 = vpop.f32.mrb[51].mxu1 }
 0x2e8   : > { %v1777_v49 = vadd.f32 %v1776_v47, %v1775_v41 }
 0x2ec   : > { %v1642_v50 = vpop.f32.mrb[44].mxu0 }
 0x2ed   : > { %v1761_v51 = vsel %vm1749_vm13, %v1642_v50, 0.0  ;;  %v2157_v52 = vpop.f32.mrb[45].mxu0 }
 0x2ee   : > { %v1762_v53 = vadd.f32 %v1761_v51, %v1760_v45  ;;  %v1645_v54 = vpop.f32.mrb[46].mxu0 }
 0x2ef   : > { %v1778_v8 = vsel %vm1749_vm13, %v1645_v54, 0.0  ;;  %v2158_v55 = vpop.f32.mrb[47].mxu0 }
 0x2f0   : > { %v1779_v56 = vadd.f32 %v1778_v8, %v1777_v49 }
 0x2f4   : > { %v1692_v57 = vpop.f32.mrb[52].mxu1 }
 0x2f5   : > { %v1763_v58 = vsel %vm1749_vm13, %v1692_v57, 0.0  ;;  %v2163_v59 = vpop.f32.mrb[53].mxu1 }
 0x2f6   : > { %v1764_v60 = vadd.f32 %v1763_v58, %v1762_v53  ;;  %v1695_v61 = vpop.f32.mrb[54].mxu1 }
 0x2f7   : > { %v1780_v62 = vsel %vm1749_vm13, %v1695_v61, 0.0  ;;  %v2164_v63 = vpop.f32.mrb[55].mxu1 }
 0x2f8   : > { %v1781_v0 = vadd.f32 %v1780_v62, %v1779_v56 }
 0x2fc   : > { %v1742_v1 = vpop.f32.mrb[48].mxu0 }
 0x2fd   : > { %v1765_v2 = vsel %vm1749_vm13, %v1742_v1, 0.0  ;;  %v2169_v13 = vpop.f32.mrb[49].mxu0 }
 0x2fe   : > { %v1766_v4 = vadd.f32 %v1765_v2, %v1764_v60  ;;  %v1745_v5 = vpop.f32.mrb[50].mxu0 }
 0x2ff   : > { %v1782_v7 = vsel %vm1749_vm13, %v1745_v5, 0.0  ;;  %v2170_v9 = vpop.f32.mrb[51].mxu0 }
 0x300   : > { %v1791_v10 = vmul.f32 %v1964_v3, %v1766_v4  ;;  %v1783_v11 = vadd.f32 %v1782_v7, %v1781_v0 }
 0x302   : > { %v1800_v12 = vadd.f32 %v1965_v6, %v1791_v10  ;;  %v1792_v14 = vmul.f32 %v1964_v3, %v1783_v11 }
 0x304   : > { %v1801_v15 = vadd.f32 %v1965_v6, %v1792_v14  ;;  %vm1802_vm11 = vcmp.ge.f32.partialorder %v1800_v12, 0.0  ;;  %v1804_v16 = vmul.f32 0.2, %v1800_v12 }
 0x306   : > { %v1806_v18 = vsel %vm1802_vm11, %v1800_v12, %v1804_v16  ;;  %vm1803_vm14 = vcmp.ge.f32.partialorder %v1801_v15, 0.0  ;;  %v1805_v19 = vmul.f32 0.2, %v1801_v15 }
 0x307   : > { %v1810_v21 = vmul.f32 %v1808_v17, %v1806_v18 }
 0x308   : > { %v1807_v22 = vsel %vm1803_vm14, %v1801_v15, %v1805_v19 }
 0x309   : > { %v1812_v23 = vsel %vm1749_vm13, %v1810_v21, 0.0  ;;  %v1811_v24 = vmul.f32 %v1809_v20, %v1807_v22 }
 0x30a   : > { %1813 = vadd.xlane.f32.xlu0 %v1812_v23 }
 0x30b   : > { %v1815_v25 = vsel %vm1749_vm13, %v1811_v24, 0.0 }
 0x30c   : > { %1816 = vadd.xlane.f32.xlu1 %v1815_v25 }
 0x397   : > { %v1814_v26 = vpop.xlane.xlu0 %1813 }
 0x399   : > { %v1817_v27 = vpop.xlane.xlu1 %1816 }
 0x39a   : > { %v1818_v28 = vadd.f32 %v1817_v27, %v1814_v26 }
 0x39c   : > { %v1819_v29 = vrot.slane %v1818_v28, 4 }
 0x39e   : > { %v1820_v30 = vadd.f32 %v1819_v29, %v1818_v28 }
 0x3a0   : > { %v1821_v31 = vrot.slane %v1820_v30, 2 }
 0x3a2   : > { %v1822_v32 = vadd.f32 %v1821_v31, %v1820_v30 }
 0x3a4   : > { %v1823_v33 = vrot.slane %v1822_v32, 1 }
 0x3a6   : > { %v1824_v35 = vadd.f32 %v1823_v33, %v1822_v32 }
 0x3a8   : > { %v1826_v36 = vadd.f32 %v1825_v34, %v1824_v35 }
 0x3aa   : > { %v1966_v37 = vmul.f32 -1.442695, %v1826_v36 }
 0x3ac   : > { %2243 = vpow2.f32 %v1966_v37 }
 0x3b6   : > { %v2244_v38 = vpop.eup %2243 }
 0x3b7   : > { %v1830_v39 = vadd.f32 1.0, %v2244_v38 }
 0x3b9   : > { %2245 = vrcp.f32 %v1830_v39 }
 0x3c3   : > { %v2246_v40 = vpop.eup %2245 }
 0x3c4   : > { %1834 = vst.msk [vmem:[%s411_s20] sm:$0x1] %vm1833_vm15, %v2246_v40 }
 0x3c5 PF: > { %s24_s23 = sadd.s32 1, %s2253_s23  }
 0x3c6   : > { %p21_p4 = scmp.ge.s32.totalorder %s24_s23, 4  }
 0x3c8   :  { %23 = sbr.rel (!%p21_p4) target bundleno = 3 (0x3), region = 98 }

</bundles_post_ra>
